<compile_context>
chip_gen: v5e
topology: v5e:2x2
jax: 0.10.0
libtpu: 0.0.40
codegen_flags: <defaults>
</compile_context>

<pallas_src>
import jax
import jax.numpy as jnp
from jax import lax
from jax.experimental import pallas as pl
from jax.experimental.pallas import tpu as pltpu


# -----------------------------------------------------------------------------
# Batched GlobalPart attention (traced inside the kernels below).
#   proj = x @ [Wg | wts] + [bg | bts+bps]   (one MXU matmul for g AND theta scores)
#   ps   = einsum('bqc,bkc->bqt')            (phi scores with T on the lane axis)
#   f    = ts + ps -> LeakyReLU(0.2) -> softmax(-1) + C_k -> att @ g
# -----------------------------------------------------------------------------
def _attention_block(x3, wall, ball, wps, ck):
    BB, T, C = x3.shape
    Cg = wall.shape[1] - 1
    x2 = x3.reshape(BB * T, C)                                   # free: T is sublane-tiled

    proj = jnp.dot(x2, wall, preferred_element_type=jnp.float32) + ball   # (BB*T, Cg+1)
    g3 = proj[:, :Cg].reshape(BB, T, Cg)                                   # (BB, T, Cg)
    ts = proj[:, Cg:Cg + 1].reshape(BB, T, 1)                              # theta scores (+bias)

    # phi scores with T on lanes (flash-style batched einsum, q-dim = 1).
    wps_b = jnp.broadcast_to(wps.reshape(1, 1, C), (BB, 1, C))
    ps = jnp.einsum('bqc,bkc->bqk', wps_b, x3,
                    preferred_element_type=jnp.float32)                    # (BB, 1, T)

    f = ts + ps                                                            # (BB, T, T)
    f = jnp.where(f >= 0.0, f, 0.2 * f)                                    # LeakyReLU(0.2)
    m = jnp.max(f, axis=-1, keepdims=True)
    e = jnp.exp(f - m)
    # exact divide kept on purpose (approx reciprocal exceeds the 1e-4 tolerance)
    att = e / jnp.sum(e, axis=-1, keepdims=True) + ck                      # softmax + C_k
    return jnp.einsum('btk,bkc->btc', att, g3,
                      preferred_element_type=jnp.float32)                  # (BB, T, Cg)


# -----------------------------------------------------------------------------
# Fused path: attention + BatchNorm2d (training-mode batch stats, eps=1e-5) + ReLU
# for ALL batches in a single launch (no HBM round trip of the intermediate y).
# -----------------------------------------------------------------------------
def _fused_kernel(x3_ref, wall_ref, ball_ref, wps_ref, ck_ref, gamma_ref, beta_ref, o_ref):
    B, T, _ = x3_ref.shape
    Cg = wall_ref.shape[1] - 1
    y = _attention_block(x3_ref[...], wall_ref[...], ball_ref[...], wps_ref[...], ck_ref[...])
    y2 = y.reshape(B * T, Cg)
    n = float(B * T)
    mean = jnp.sum(y2, axis=0, keepdims=True) / n
    var = jnp.maximum(jnp.sum(y2 * y2, axis=0, keepdims=True) / n - mean * mean, 0.0)
    scale = gamma_ref[...] * lax.rsqrt(var + 1e-5)
    shift = beta_ref[...] - mean * scale
    o_ref[...] = jnp.maximum(y2 * scale + shift, 0.0)


# -----------------------------------------------------------------------------
# Tiled path (large inputs / v7x 64 MiB VMEM): kernel 1 does batched attention on
# BB-batch blocks ("parallel" grid -> both TCs) + per-block partial BN sums; kernel 2
# is a lane-dense, in-place normalize + ReLU with globally reduced statistics.
# -----------------------------------------------------------------------------
def _attn_stats_kernel(x3_ref, wall_ref, ball_ref, wps_ref, ck_ref, y_ref, s_ref, q_ref):
    BB, T, _ = x3_ref.shape
    Cg = wall_ref.shape[1] - 1
    y = _attention_block(x3_ref[...], wall_ref[...], ball_ref[...], wps_ref[...], ck_ref[...])
    y_ref[...] = y
    y2 = y.reshape(BB * T, Cg)
    s = jnp.sum(y2, axis=0, keepdims=True)
    q = jnp.sum(y2 * y2, axis=0, keepdims=True)
    # broadcast into an 8-row slab so the stat block stays (8, Cg)-tiled; wrapper reads row 0.
    s_ref[0] = jnp.broadcast_to(s, (8, Cg))
    q_ref[0] = jnp.broadcast_to(q, (8, Cg))


def _bn_relu_kernel(y_ref, scale_ref, shift_ref, o_ref):
    o_ref[...] = jnp.maximum(y_ref[...] * scale_ref[...] + shift_ref[...], 0.0)


# -----------------------------------------------------------------------------
# Wrapper helpers
# -----------------------------------------------------------------------------
def _fold_params(p):
    """Fold theta/phi convs + concat_project into the g matmul and one score vector."""
    wts = jnp.sum(p["wt"] * p["w1"], axis=1)[:, None]            # (C, 1) theta score col
    wps = jnp.sum(p["wp"] * p["w2"], axis=1)[None, :]            # (1, C) phi score vec
    bts = jnp.sum(p["bt"] * p["w1"]).reshape(1, 1)
    bps = jnp.sum(p["bp"] * p["w2"]).reshape(1, 1)
    wall = jnp.concatenate([p["wg"], wts], axis=1)               # (C, Cg+1)
    ball = jnp.concatenate([p["bg"], bts + bps], axis=1)         # (1, Cg+1)
    return wall, ball, wps


def _vmem_capacity_bytes():
    try:
        return int(pltpu.get_tpu_info().vmem_capacity_bytes)
    except Exception:
        return 64 << 20   # conservative default (v7x per-TC VMEM)


def _fused_bytes(B, T, C, Cg):
    rows = B * T
    # x + proj + g + 2x (T,T) score temps + y + out, all f32
    return 4 * (rows * C + rows * (Cg + 1) + rows * Cg + 2 * B * T * T + 2 * rows * Cg)


def _pick_block_b(B, T, C, Cg, budget):
    def blk_bytes(bb):
        rows = bb * T
        return 4 * (2 * rows * C + 2 * rows * Cg + 2 * 2 * 8 * Cg   # double-buffered I/O
                    + rows * (Cg + 1) + 2 * bb * T * T + rows * Cg)  # in-kernel temps
    divs = [d for d in range(1, B + 1) if B % d == 0]
    fits = [d for d in divs if blk_bytes(d) <= budget] or [1]
    multi = [d for d in fits if B // d >= 2]       # keep >=2 blocks so both TCs get work
    return max(multi if multi else fits)


def _pick_bn_rows(R, L, budget):
    target = max(1, budget // (8 * L))             # f32, ~2 live buffers
    legal = [d for d in range(1, R + 1) if R % d == 0 and (d % 8 == 0 or d == R)]
    fits = [d for d in legal if d <= target]
    return max(fits) if fits else min(legal)


# -----------------------------------------------------------------------------
# Wrapper
# -----------------------------------------------------------------------------
def single_global_part(x, p, *, force_tiled=False, block_b=None):
    N, M, T, C = x.shape
    B = N * M
    Cg = p["wg"].shape[1]
    wall, ball, wps = _fold_params(p)
    xb3 = x.reshape(B, T, C)

    cap = _vmem_capacity_bytes()
    vmem_limit = int(min(max(cap * 3 // 4, 32 << 20), 112 << 20))
    use_fused = (not force_tiled) and (_fused_bytes(B, T, C, Cg) <= cap // 2)

    if use_fused:
        out2 = pl.pallas_call(
            _fused_kernel,
            out_shape=jax.ShapeDtypeStruct((B * T, Cg), jnp.float32),
            compiler_params=pltpu.CompilerParams(vmem_limit_bytes=vmem_limit),
        )(xb3, wall, ball, wps, p["ck"], p["gamma"], p["beta"])
        # TODO(synk): dropout is None in this configuration, so no dropout op is emitted.
        return out2.reshape(N, M, T, Cg)

    # ---------------- tiled path ----------------
    BB = block_b if block_b is not None else _pick_block_b(B, T, C, Cg, cap // 4)
    assert B % BB == 0, (B, BB)
    nb = B // BB
    weights = (wall, ball, wps, p["ck"])

    def wfull(a):
        return pl.BlockSpec(a.shape, lambda i, n=a.ndim: (0,) * n)

    y, psum, psq = pl.pallas_call(
        _attn_stats_kernel,
        out_shape=(jax.ShapeDtypeStruct((B, T, Cg), jnp.float32),
                   jax.ShapeDtypeStruct((nb, 8, Cg), jnp.float32),
                   jax.ShapeDtypeStruct((nb, 8, Cg), jnp.float32)),
        grid=(nb,),
        in_specs=[pl.BlockSpec((BB, T, C), lambda i: (i, 0, 0))]
                 + [wfull(w) for w in weights],
        out_specs=[pl.BlockSpec((BB, T, Cg), lambda i: (i, 0, 0)),
                   pl.BlockSpec((1, 8, Cg), lambda i: (i, 0, 0)),
                   pl.BlockSpec((1, 8, Cg), lambda i: (i, 0, 0))],
        compiler_params=pltpu.CompilerParams(dimension_semantics=("parallel",),
                                             vmem_limit_bytes=vmem_limit),
    )(xb3, *weights)

    cnt = float(B * T)
    mean = jnp.sum(psum[:, 0, :], axis=0, keepdims=True) / cnt             # (1, Cg)
    var = jnp.maximum(jnp.sum(psq[:, 0, :], axis=0, keepdims=True) / cnt - mean * mean, 0.0)
    scale = p["gamma"] * lax.rsqrt(var + 1e-5)
    shift = p["beta"] - mean * scale

    # Lane-dense, in-place BN + ReLU: view y as (R, L) with L a multiple of 128 lanes.
    total = B * T * Cg
    L = next((c for c in (1024, 512, 256, 128) if total % c == 0 and c % Cg == 0), 0)
    if L:
        R = total // L
        RB = _pick_bn_rows(R, L, cap // 8)
        y = y.reshape(R, L)                            # free metadata reshape (row-major)
        scale2 = jnp.tile(scale, (1, L // Cg))
        shift2 = jnp.tile(shift, (1, L // Cg))
        out2 = pl.pallas_call(
            _bn_relu_kernel,
            out_shape=jax.ShapeDtypeStruct((R, L), jnp.float32),
            grid=(R // RB,),
            in_specs=[pl.BlockSpec((RB, L), lambda i: (i, 0)),
                      pl.BlockSpec((1, L), lambda i: (0, 0)),
                      pl.BlockSpec((1, L), lambda i: (0, 0))],
            out_specs=pl.BlockSpec((RB, L), lambda i: (i, 0)),
            input_output_aliases={0: 0},               # normalize y in place
            compiler_params=pltpu.CompilerParams(dimension_semantics=("parallel",),
                                                 vmem_limit_bytes=vmem_limit),
        )(y, scale2, shift2)
        # TODO(synk): dropout is None in this configuration, so no dropout op is emitted.
        return out2.reshape(N, M, T, Cg)

    # Fallback (odd shapes): let XLA fuse the trivially elementwise normalize + ReLU.
    out2 = jnp.maximum(y.reshape(B * T, Cg) * scale + shift, 0.0)
    return out2.reshape(N, M, T, Cg)


# -----------------------------------------------------------------------------
# Pure-JAX reference (unfolded math, training-mode BatchNorm) for validation.
# -----------------------------------------------------------------------------
def reference(x, p):
    N, M, T, C = x.shape
    xb = x.reshape(N * M, T, C)
    g_x = xb @ p["wg"] + p["bg"]
    theta = xb @ p["wt"] + p["bt"]
    phi = xb @ p["wp"] + p["bp"]
    f = (jnp.sum(theta * p["w1"], -1)[:, :, None] +
         jnp.sum(phi * p["w2"], -1)[:, None, :])
    att = jnp.where(f >= 0, f, 0.2 * f)
    att = jax.nn.softmax(att, axis=-1) + p["ck"]
    y = att @ g_x
    y2 = y.reshape(-1, y.shape[-1])
    mean = y2.mean(0, keepdims=True)
    var = ((y2 - mean) ** 2).mean(0, keepdims=True)
    out = jnp.maximum((y2 - mean) * p["gamma"] * lax.rsqrt(var + 1e-5) + p["beta"], 0.0)
    return out.reshape(N, M, T, -1)


if __name__ == "__main__":
    # Shapes implied by the module: in_channels = C (last axis), output_channels = C,
    # so inter_channels = C//2 and g_channels = in_channels (view() constraint).
    N, M, T, C = 2, 4, 8, 16
    inter = C // 2          # output_channels // 2
    Cg = C                  # g_channels == in_channels

    key = jax.random.PRNGKey(0)
    ks = jax.random.split(key, 9)

    def kaiming(k, shape, fan_in):
        return jax.random.normal(k, shape, jnp.float32) * jnp.sqrt(2.0 / fan_in)

    params = dict(
        wg=kaiming(ks[0], (C, Cg), C),                   # Conv1d g     (stored (in, out))
        bg=jnp.zeros((1, Cg), jnp.float32),
        wt=kaiming(ks[1], (C, inter), C),                # Conv1d theta
        bt=jnp.zeros((1, inter), jnp.float32),
        wp=kaiming(ks[2], (C, inter), C),                # Conv1d phi
        bp=jnp.zeros((1, inter), jnp.float32),
        w1=kaiming(ks[3], (1, inter), 2 * inter),        # concat_project weight (theta half)
        w2=kaiming(ks[4], (1, inter), 2 * inter),        # concat_project weight (phi half)
        ck=0.1 * jax.random.normal(ks[5], (T, T), jnp.float32),             # C_k parameter
        gamma=1.0 + 0.1 * jax.random.normal(ks[6], (1, Cg), jnp.float32),   # BN weight
        beta=0.1 * jax.random.normal(ks[7], (1, Cg), jnp.float32),          # BN bias
    )

    x = jax.random.normal(ks[8], (N, M, T, C), jnp.float32)

    ref = jax.block_until_ready(reference(x, params))

    # Fused single-launch path (default at this size).
    out = jax.block_until_ready(single_global_part(x, params))
    assert out.shape == (N, M, T, C), out.shape
    err = float(jnp.max(jnp.abs(out - ref)))
    assert err < 2e-4, f"fused path max abs error {err}"

    # Tiled path (auto-picked BB -> 2 parallel blocks) to validate the large-input route.
    out_t = jax.block_until_ready(single_global_part(x, params, force_tiled=True))
    err_t = float(jnp.max(jnp.abs(out_t - ref)))
    assert err_t < 2e-4, f"tiled path max abs error {err_t}"

    print("KERNEL_OK")
</pallas_src>

<mosaic_0001>
module attributes {stable_mosaic.version = 11 : i64} {
  func.func @_fused_kernel(%arg0: memref<8x8x16xf32, #tpu.memory_space<vmem>>, %arg1: memref<16x17xf32, #tpu.memory_space<vmem>>, %arg2: memref<1x17xf32, #tpu.memory_space<vmem>>, %arg3: memref<1x16xf32, #tpu.memory_space<vmem>>, %arg4: memref<8x8xf32, #tpu.memory_space<vmem>>, %arg5: memref<1x16xf32, #tpu.memory_space<vmem>>, %arg6: memref<1x16xf32, #tpu.memory_space<vmem>>, %arg7: memref<64x16xf32, #tpu.memory_space<vmem>>) attributes {dimension_semantics = [], scalar_prefetch = 0 : i64, scratch_operands = 0 : i64, tpu.core_type = #tpu.core_type<tc>} {
    %c0 = arith.constant 0 : index
    %c0_0 = arith.constant 0 : index
    %c0_1 = arith.constant 0 : index
    %0 = vector.load %arg0[%c0, %c0_0, %c0_1] : memref<8x8x16xf32, #tpu.memory_space<vmem>>, vector<8x8x16xf32>
    %c0_2 = arith.constant 0 : index
    %c0_3 = arith.constant 0 : index
    %1 = vector.load %arg1[%c0_2, %c0_3] : memref<16x17xf32, #tpu.memory_space<vmem>>, vector<16x17xf32>
    %c0_4 = arith.constant 0 : index
    %c0_5 = arith.constant 0 : index
    %2 = vector.load %arg2[%c0_4, %c0_5] : memref<1x17xf32, #tpu.memory_space<vmem>>, vector<1x17xf32>
    %c0_6 = arith.constant 0 : index
    %c0_7 = arith.constant 0 : index
    %3 = vector.load %arg3[%c0_6, %c0_7] : memref<1x16xf32, #tpu.memory_space<vmem>>, vector<1x16xf32>
    %c0_8 = arith.constant 0 : index
    %c0_9 = arith.constant 0 : index
    %4 = vector.load %arg4[%c0_8, %c0_9] : memref<8x8xf32, #tpu.memory_space<vmem>>, vector<8x8xf32>
    %5 = vector.shape_cast %0 : vector<8x8x16xf32> to vector<64x16xf32>
    %cst = arith.constant dense<0.000000e+00> : vector<64x17xf32>
    %6 = tpu.matmul %5, %1, %cst {dimension_numbers = #tpu.dot_dimension_numbers<[1], [0], [0], [1], [0, 0, 1, 1], [], []>} : vector<64x16xf32>, vector<16x17xf32>, vector<64x17xf32> -> vector<64x17xf32>
    %7 = vector.broadcast %2 : vector<1x17xf32> to vector<64x17xf32>
    %8 = arith.addf %6, %7 : vector<64x17xf32>
    %9 = vector.extract_strided_slice %8 {offsets = [0, 0], sizes = [64, 16], strides = [1, 1]} : vector<64x17xf32> to vector<64x16xf32>
    %10 = vector.shape_cast %9 : vector<64x16xf32> to vector<8x8x16xf32>
    %11 = vector.extract_strided_slice %8 {offsets = [0, 16], sizes = [64, 1], strides = [1, 1]} : vector<64x17xf32> to vector<64x1xf32>
    %12 = vector.shape_cast %11 : vector<64x1xf32> to vector<8x8x1xf32>
    %13 = vector.shape_cast %3 : vector<1x16xf32> to vector<1x1x16xf32>
    %14 = vector.shape_cast %13 : vector<1x1x16xf32> to vector<1x1x16xf32>
    %15 = vector.broadcast %14 : vector<1x1x16xf32> to vector<8x1x16xf32>
    "tpu.trace_start"() <{level = 10 : i32, message = "bqc,bkc->bqk"}> : () -> ()
    %cst_10 = arith.constant dense<0.000000e+00> : vector<8x1x8xf32>
    %16 = tpu.matmul %15, %0, %cst_10 {dimension_numbers = #tpu.dot_dimension_numbers<[2], [2], [1], [1], [0, 0, 0, 1, 1, 1], [0], [0]>} : vector<8x1x16xf32>, vector<8x8x16xf32>, vector<8x1x8xf32> -> vector<8x1x8xf32>
    "tpu.trace_stop"() : () -> ()
    %17 = vector.broadcast %12 : vector<8x8x1xf32> to vector<8x8x8xf32>
    %18 = vector.broadcast %16 : vector<8x1x8xf32> to vector<8x8x8xf32>
    %19 = arith.addf %17, %18 : vector<8x8x8xf32>
    %cst_11 = arith.constant 0.000000e+00 : f32
    %20 = vector.broadcast %cst_11 : f32 to vector<8x8x8xf32>
    %21 = arith.cmpf oge, %19, %20 : vector<8x8x8xf32>
    %cst_12 = arith.constant 2.000000e-01 : f32
    %22 = vector.broadcast %cst_12 : f32 to vector<8x8x8xf32>
    %23 = arith.mulf %22, %19 : vector<8x8x8xf32>
    %24 = arith.select %21, %19, %23 : vector<8x8x8xi1>, vector<8x8x8xf32>
    %cst_13 = arith.constant dense<0xFF800000> : vector<8x8xf32>
    %25 = vector.multi_reduction <maximumf>, %24, %cst_13 [2] : vector<8x8x8xf32> to vector<8x8xf32>
    %26 = vector.shape_cast %25 : vector<8x8xf32> to vector<8x8x1xf32>
    %27 = vector.broadcast %26 : vector<8x8x1xf32> to vector<8x8x8xf32>
    %28 = arith.subf %24, %27 : vector<8x8x8xf32>
    %29 = math.exp %28 : vector<8x8x8xf32>
    %cst_14 = arith.constant dense<0.000000e+00> : vector<8x8xf32>
    %30 = vector.multi_reduction <add>, %29, %cst_14 [2] : vector<8x8x8xf32> to vector<8x8xf32>
    %31 = vector.shape_cast %30 : vector<8x8xf32> to vector<8x8x1xf32>
    %32 = vector.broadcast %31 : vector<8x8x1xf32> to vector<8x8x8xf32>
    %33 = arith.divf %29, %32 : vector<8x8x8xf32>
    %34 = vector.shape_cast %4 : vector<8x8xf32> to vector<1x8x8xf32>
    %35 = vector.broadcast %34 : vector<1x8x8xf32> to vector<8x8x8xf32>
    %36 = arith.addf %33, %35 : vector<8x8x8xf32>
    "tpu.trace_start"() <{level = 10 : i32, message = "btk,bkc->btc"}> : () -> ()
    %cst_15 = arith.constant dense<0.000000e+00> : vector<8x8x16xf32>
    %37 = tpu.matmul %36, %10, %cst_15 {dimension_numbers = #tpu.dot_dimension_numbers<[2], [1], [1], [2], [0, 0, 0, 1, 1, 2], [0], [0]>} : vector<8x8x8xf32>, vector<8x8x16xf32>, vector<8x8x16xf32> -> vector<8x8x16xf32>
    "tpu.trace_stop"() : () -> ()
    %38 = vector.shape_cast %37 : vector<8x8x16xf32> to vector<64x16xf32>
    %cst_16 = arith.constant dense<0.000000e+00> : vector<16xf32>
    %39 = vector.multi_reduction <add>, %38, %cst_16 [0] : vector<64x16xf32> to vector<16xf32>
    %40 = vector.shape_cast %39 : vector<16xf32> to vector<1x16xf32>
    %cst_17 = arith.constant 6.400000e+01 : f32
    %41 = vector.broadcast %cst_17 : f32 to vector<1x16xf32>
    %42 = arith.divf %40, %41 : vector<1x16xf32>
    %43 = arith.mulf %38, %38 : vector<64x16xf32>
    %cst_18 = arith.constant dense<0.000000e+00> : vector<16xf32>
    %44 = vector.multi_reduction <add>, %43, %cst_18 [0] : vector<64x16xf32> to vector<16xf32>
    %45 = vector.shape_cast %44 : vector<16xf32> to vector<1x16xf32>
    %cst_19 = arith.constant 6.400000e+01 : f32
    %46 = vector.broadcast %cst_19 : f32 to vector<1x16xf32>
    %47 = arith.divf %45, %46 : vector<1x16xf32>
    %48 = arith.mulf %42, %42 : vector<1x16xf32>
    %49 = arith.subf %47, %48 : vector<1x16xf32>
    %cst_20 = arith.constant 0.000000e+00 : f32
    %50 = vector.broadcast %cst_20 : f32 to vector<1x16xf32>
    %51 = arith.maximumf %49, %50 : vector<1x16xf32>
    %c0_21 = arith.constant 0 : index
    %c0_22 = arith.constant 0 : index
    %52 = vector.load %arg5[%c0_21, %c0_22] : memref<1x16xf32, #tpu.memory_space<vmem>>, vector<1x16xf32>
    %cst_23 = arith.constant 9.99999974E-6 : f32
    %53 = vector.broadcast %cst_23 : f32 to vector<1x16xf32>
    %54 = arith.addf %51, %53 : vector<1x16xf32>
    %55 = math.rsqrt %54 : vector<1x16xf32>
    %56 = arith.mulf %52, %55 : vector<1x16xf32>
    %c0_24 = arith.constant 0 : index
    %c0_25 = arith.constant 0 : index
    %57 = vector.load %arg6[%c0_24, %c0_25] : memref<1x16xf32, #tpu.memory_space<vmem>>, vector<1x16xf32>
    %58 = arith.mulf %42, %56 : vector<1x16xf32>
    %59 = arith.subf %57, %58 : vector<1x16xf32>
    %60 = vector.broadcast %56 : vector<1x16xf32> to vector<64x16xf32>
    %61 = arith.mulf %38, %60 : vector<64x16xf32>
    %62 = vector.broadcast %59 : vector<1x16xf32> to vector<64x16xf32>
    %63 = arith.addf %61, %62 : vector<64x16xf32>
    %cst_26 = arith.constant 0.000000e+00 : f32
    %64 = vector.broadcast %cst_26 : f32 to vector<64x16xf32>
    %65 = arith.maximumf %63, %64 : vector<64x16xf32>
    %c0_27 = arith.constant 0 : index
    %c0_28 = arith.constant 0 : index
    %66 = vector.load %arg7[%c0_27, %c0_28] : memref<64x16xf32, #tpu.memory_space<vmem>>, vector<64x16xf32>
    tpu.vector_store %arg7[%c0_27, %c0_28], %65 {strides = array<i32>} : memref<64x16xf32, #tpu.memory_space<vmem>>, vector<64x16xf32>,
    return
  }
}

</mosaic_0001>

<bundles_post_ra>
// kernel: tpu_custom_call.1
= control target key start
LH: loop header
LB: loop body
LE: loop exit
PB: predicated region body
PF: predicated region fallthrough
CT: control target
= control target key end

     0   :  { %12 = vsyncpa [#allocation3], 0  ;;  %s1330_s0 = inlined_call_operand.hbm [shape: f32[8,8,16], index: 0, kind: input, shape index: {}]   ;;  %s1331_s1 = inlined_call_operand.hbm [shape: f32[16,17], index: 1, kind: input, shape index: {}]   ;;  %s1332_s2 = inlined_call_operand.vmem [shape: f32[1,17], index: 2, kind: input, shape index: {}]   ;;  %s1333_s3 = inlined_call_operand.vmem [shape: f32[1,16], index: 3, kind: input, shape index: {}]   ;;  %s1334_s4 = inlined_call_operand.hbm [shape: f32[8,8], index: 4, kind: input, shape index: {}]   ;;  %s1335_s5 = inlined_call_operand.vmem [shape: f32[1,16], index: 5, kind: input, shape index: {}]   ;;  %s1336_s6 = inlined_call_operand.vmem [shape: f32[1,16], index: 6, kind: input, shape index: {}]   ;;  %s1337_s7 = inlined_call_operand.vmem [shape: f32[64,16], index: 7, kind: output, shape index: {}]  }
   0x1   :  { %13 = vsyncpa [#allocation5], 0  ;;  %s31_s26 = sshll.u32 %s1331_s1, 4  ;;  %s1062_s27 = smov [#allocation4]   ;;  %s32_s26 = int_to_ptr.hbm [resolvable:$true] %s31_s26 }
   0x2   :  { %s33_s28 = sshll.u32 %s1062_s27, 4  ;;  %s18_s8 = sshll.u32 %s1330_s0, 4  ;;  %s34_s28 = int_to_ptr.vmem [resolvable:$true] %s33_s28  ;;  %s19_s8 = int_to_ptr.hbm [resolvable:$true] %s18_s8 }
   0x3   :  { %s1063_s9 = smov 128   ;;  %s1064_s10 = smov 8  }
   0x4   :  { %39 = dma.hbm_to_vmem [thread:$0]  %s32_s26, 256, %s34_s28, [#allocation5], %s1063_s9, %s1063_s9, %s1064_s10  }
   0x5   :  { %s1065_s11 = smov [#allocation2]   ;;  %s49_s15 = sshll.u32 %s1334_s4, 4  ;;  %s50_s15 = int_to_ptr.hbm [resolvable:$true] %s49_s15 }
   0x6   :  { %s20_s12 = sshll.u32 %s1065_s11, 4  ;;  %s1066_s1 = smov [#allocation6]   ;;  %s21_s12 = int_to_ptr.vmem [resolvable:$true] %s20_s12 }
   0x7   :  { %26 = dma.hbm_to_vmem [thread:$0]  %s19_s8, 1024, %s21_s12, [#allocation3], %s1063_s9, %s1063_s9, %s1064_s10  }
   0x8   :  { %s51_s16 = sshll.u32 %s1066_s1, 4  ;;  %s52_s16 = int_to_ptr.vmem [resolvable:$true] %s51_s16 }
   0x9   :  { %54 = dma.hbm_to_vmem [thread:$0]  %s50_s15, 128, %s52_s16, [#allocation5]  }
   0xa   :  { %1058 = dma.done.wait [#allocation3], 1024  }
   0xb   :  { %1059 = vsyncadd [#allocation3], 4294966272 }
   0xc   :  { %1060 = dma.done.wait [#allocation5], 384  }
   0xd   :  { %1061 = vsyncadd [#allocation5], 4294966912  ;;  %v80_v0 = vld [vmem:[#allocation4 + $0x8] sm:$0xff]  ;;  %v79_v1 = vld [vmem:[#allocation4] sm:$0xff]  ;;  %vm87_vm0 = vcmask 130048   ;;  %v1067_v11 = vmov 16  }
   0xe   :  { %126 = vmatpush.msra.mxu0 %v80_v0  ;;  %v71_v2 = vld [vmem:[#allocation2] sm:$0xff]  ;;  %935 = vmatpush.msra.mxu2 %v80_v0  ;;  %v77_v3 = vld [vmem:[#allocation2 + $0x30] sm:$0xff]  ;;  %v78_v4 = vld [vmem:[#allocation2 + $0x38] sm:$0xff]  ;;  %vm396_vm2 = vcmask 64512  }
   0xf   :  { %936 = vmatpush.msra.mxu3 %v80_v0  ;;  %911 = vmatpush.xpose.msk.msra.mxu1 %vm87_vm0, %v71_v2  ;;  %v72_v5 = vld [vmem:[#allocation2 + $0x8] sm:$0xff]  ;;  %v74_v6 = vld [vmem:[#allocation2 + $0x18] sm:$0xff]  ;;  %v73_v7 = vld [vmem:[#allocation2 + $0x10] sm:$0xff] }
  0x10   :  { %127 = vmatpush.msra.mxu0 %v79_v1  ;;  %937 = vmatpush.msra.mxu2 %v79_v1  ;;  %v75_v8 = vld [vmem:[#allocation2 + $0x20] sm:$0xff]  ;;  %v76_v9 = vld [vmem:[#allocation2 + $0x28] sm:$0xff] }
  0x11   :  { %903 = vmatmul.msk.f32.vlgmr.msra.gmra.mxu0 %vm87_vm0, %v71_v2  ;;  %909 = vmatmul.msk.f32.vlgmr.msra.gmra.mxu2 %vm87_vm0, %v77_v3  ;;  %v82_v10 = vld [vmem:[%s1333_s3] sm:$0x1] }
  0x12   :  { %938 = vmatpush.msra.mxu3 %v79_v1  ;;  %913 = vmatpush.xpose.msk.msrb.mxu2 %vm87_vm0, %v72_v5  ;;  %v949_v12 = vld [vmem:[%s1332_s2] ss:$0 sm:$0xff] }
  0x13   :  { %910 = vmatmul.msk.f32.vlgmr.msra.gmra.mxu3 %vm87_vm0, %v78_v4  ;;  %917 = vmatpush.xpose.msk.msrb.mxu1 %vm87_vm0, %v74_v6 }
  0x14   :  { %915 = vmatpush.xpose.msk.msrb.mxu3 %vm87_vm0, %v73_v7  ;;  %912 = vmatmul.msk.f32.vlgmr.msra.gmra.mxu1 %vm87_vm0, %v82_v10 }
  0x15   :  { %946 = vset.pattern.permute.xlu0 %v1067_v11  ;;  %947 = vset.pattern.permute.xlu1 %v1067_v11 }
  0x16   :  { %919 = vmatpush.xpose.msk.msra.mxu2 %vm87_vm0, %v75_v8  ;;  %948 = vset.pattern.permute.xlu2 %v1067_v11 }
  0x17   :  { %923 = vmatpush.xpose.msk.msra.mxu1 %vm87_vm0, %v77_v3 }
  0x18   :  { %921 = vmatpush.xpose.msk.msra.mxu3 %vm87_vm0, %v76_v9 }
  0x19   :  { %904 = vmatmul.msk.f32.gmra.mxu0 %vm87_vm0, %v72_v5  ;;  %914 = vmatmul.msk.f32.vlgmr.msrb.gmra.mxu2 %vm87_vm0, %v82_v10 }
  0x1a   :  { %925 = vmatpush.xpose.msk.msrb.mxu2 %vm87_vm0, %v78_v4 }
  0x1b   :  { %916 = vmatmul.msk.f32.vlgmr.msrb.gmra.mxu3 %vm87_vm0, %v82_v10 }
  0x1c   :  { %918 = vmatmul.msk.f32.vlgmr.msrb.gmra.mxu1 %vm87_vm0, %v82_v10 }
  0x21   :  { %905 = vmatmul.msk.f32.gmra.mxu0 %vm87_vm0, %v73_v7  ;;  %920 = vmatmul.msk.f32.vlgmr.msra.gmra.mxu2 %vm87_vm0, %v82_v10 }
  0x23   :  { %922 = vmatmul.msk.f32.vlgmr.msra.gmra.mxu3 %vm87_vm0, %v82_v10 }
  0x24   :  { %924 = vmatmul.msk.f32.vlgmr.msra.gmra.mxu1 %vm87_vm0, %v82_v10 }
  0x29   :  { %906 = vmatmul.msk.f32.gmra.mxu0 %vm87_vm0, %v74_v6  ;;  %926 = vmatmul.msk.f32.vlgmr.msrb.gmra.mxu2 %vm87_vm0, %v82_v10 }
  0x31   :  { %907 = vmatmul.msk.f32.gmra.mxu0 %vm87_vm0, %v75_v8 }
  0x39   :  { %908 = vmatmul.msk.f32.gmra.mxu0 %vm87_vm0, %v76_v9 }
  0x8e   :  { %v129_v13 = vpop.f32.mrf.mxu0 }
  0x8f   :  { %v130_v14 = vadd.f32 %v949_v12, %v129_v13 }
  0x91   :  { %318 = vperm.xlu0 %946, %v130_v14   ;;  %615 = vmatpush.msrb.mxu3 %v130_v14  ;;  %v173_v29 = vpop.f32.mrf.mxu1 }
  0x92   :  { %v356_v30 = vperm.slane %v173_v29, 0 }
  0x94   :  { %v147_v19 = vpop.f32.mrf.mxu2 }
  0x95   :  { %v1148_v20 = vadd.f32 %v949_v12, %v147_v19 }
  0x96   :  { %v132_v15 = vpop.f32.mrf.mxu0  ;;  %v150_v23 = vpop.f32.mrf.mxu3 }
  0x97   :  { %v133_v16 = vadd.f32 %v949_v12, %v132_v15  ;;  %v1151_v24 = vadd.f32 %v949_v12, %v150_v23 }
  0x99   :  { %323 = vperm.xlu1 %947, %v133_v16   ;;  %638 = vmatpush.msrb.mxu1 %v133_v16  ;;  %v233_v41 = vpop.f32.mrf.mxu1 }
  0x9a   :  { %v359_v53 = vperm.slane %v233_v41, 0 }
  0x9c   :  { %v193_v33 = vpop.f32.mrf.mxu2 }
  0x9d   :  { %v357_v35 = vperm.slane %v193_v33, 0 }
  0x9e   :  { %v135_v17 = vpop.f32.mrf.mxu0  ;;  %v213_v40 = vpop.f32.mrf.mxu3 }
  0x9f   :  { %v136_v18 = vadd.f32 %v949_v12, %v135_v17  ;;  %v358_v43 = vperm.slane %v213_v40, 0 }
  0xa1   :  { %661 = vmatpush.msra.mxu2 %v136_v18  ;;  %328 = vperm.xlu0 %946, %v136_v18   ;;  %v293_v52 = vpop.f32.mrf.mxu1 }
  0xa2   :  { %v362_v57 = vperm.slane %v293_v52, 0 }
  0xa4   :  { %v253_v49 = vpop.f32.mrf.mxu2 }
  0xa5   :  { %v360_v54 = vperm.slane %v253_v49, 0 }
  0xa6   :  { %v138_v21 = vpop.f32.mrf.mxu0  ;;  %v273_v51 = vpop.f32.mrf.mxu3 }
  0xa7   :  { %v139_v22 = vadd.f32 %v949_v12, %v138_v21  ;;  %v361_v56 = vperm.slane %v273_v51, 0 }
  0xa9   :  { %333 = vperm.xlu1 %947, %v139_v22   ;;  %348 = vperm.xlu0 %946, %v1148_v20  }
  0xaa   :  { %684 = vmatpush.msra.mxu3 %v139_v22 }
  0xac   :  { %v313_v5 = vpop.f32.mrf.mxu2 }
  0xad   :  { %v363_v11 = vperm.slane %v313_v5, 0 }
  0xae   :  { %v141_v25 = vpop.f32.mrf.mxu0 }
  0xaf   :  { %v142_v26 = vadd.f32 %v949_v12, %v141_v25 }
  0xb1   :  { %353 = vperm.xlu1 %947, %v1151_v24   ;;  %707 = vmatpush.msra.mxu1 %v142_v26 }
  0xb6   :  { %v144_v27 = vpop.f32.mrf.mxu0 }
  0xb7   :  { %v145_v28 = vadd.f32 %v949_v12, %v144_v27 }
  0xb9   :  { %343 = vperm.xlu2 %948, %v145_v28   ;;  %730 = vmatpush.msrb.mxu2 %v145_v28 }
  0xc1   :  { %338 = vperm.xlu2 %948, %v142_v26  }
 0x103   :  { %v319_v31 = vpop.permute.xlu0 %318 }
 0x104   :  { %v364_v32 = vadd.f32 %v356_v30, %v319_v31 }
 0x106   :  { %v380_v34 = vmul.f32 0.2, %v364_v32  ;;  %vm372_vm1 = vcmp.ge.f32.partialorder %v364_v32, 0.0 }
 0x108   :  { %v1154_v36 = vsel %vm372_vm1, %v364_v32, %v380_v34 }
 0x109   :  { %v397_v37 = vsel %vm396_vm2, %v1154_v36, -inf }
 0x10a   :  { %398 = vmax.xlane.f32.xlu2 %v397_v37 }
 0x10b   :  { %v324_v38 = vpop.permute.xlu1 %323 }
 0x10c   :  { %v365_v39 = vadd.f32 %v357_v35, %v324_v38 }
 0x10e   :  { %v381_v42 = vmul.f32 0.2, %v365_v39  ;;  %vm373_vm3 = vcmp.ge.f32.partialorder %v365_v39, 0.0 }
 0x110   :  { %v389_v44 = vsel %vm373_vm3, %v365_v39, %v381_v42 }
 0x111   :  { %v400_v45 = vsel %vm396_vm2, %v389_v44, -inf }
 0x112   :  { %401 = vmax.xlane.f32.xlu1 %v400_v45 }
 0x113   :  { %v344_v46 = vpop.permute.xlu2 %343  ;;  %v329_v47 = vpop.permute.xlu0 %328 }
 0x114   :  { %v366_v48 = vadd.f32 %v358_v43, %v329_v47  ;;  %v369_v0 = vadd.f32 %v361_v56, %v344_v46 }
 0x116   :  { %v382_v50 = vmul.f32 0.2, %v366_v48  ;;  %vm374_vm4 = vcmp.ge.f32.partialorder %v366_v48, 0.0  ;;  %v385_v13 = vmul.f32 0.2, %v369_v0  ;;  %vm377_vm8 = vcmp.ge.f32.partialorder %v369_v0, 0.0 }
 0x118   :  { %v390_v55 = vsel %vm374_vm4, %v366_v48, %v382_v50  ;;  %v393_v16 = vsel %vm377_vm8, %v369_v0, %v385_v13 }
 0x119   :  { %v403_v58 = vsel %vm396_vm2, %v390_v55, -inf  ;;  %v412_v17 = vsel %vm396_vm2, %v393_v16, -inf }
 0x11a   :  { %404 = vmax.xlane.f32.xlu0 %v403_v58 }
 0x11b   :  { %v339_v59 = vpop.permute.xlu2 %338  ;;  %v334_v60 = vpop.permute.xlu1 %333 }
 0x11c   :  { %v368_v61 = vadd.f32 %v360_v54, %v339_v59  ;;  %v367_v62 = vadd.f32 %v359_v53, %v334_v60  ;;  %v349_v63 = vpop.permute.xlu0 %348 }
 0x11d   :  { %v370_v1 = vadd.f32 %v362_v57, %v349_v63 }
 0x11e   :  { %v384_v2 = vmul.f32 0.2, %v368_v61  ;;  %v383_v3 = vmul.f32 0.2, %v367_v62  ;;  %vm375_vm5 = vcmp.ge.f32.partialorder %v367_v62, 0.0  ;;  %vm376_vm6 = vcmp.ge.f32.partialorder %v368_v61, 0.0 }
 0x11f   :  { %v386_v4 = vmul.f32 0.2, %v370_v1  ;;  %vm378_vm7 = vcmp.ge.f32.partialorder %v370_v1, 0.0 }
 0x120   :  { %v391_v6 = vsel %vm375_vm5, %v367_v62, %v383_v3  ;;  %v392_v7 = vsel %vm376_vm6, %v368_v61, %v384_v2 }
 0x121   :  { %v406_v8 = vsel %vm396_vm2, %v391_v6, -inf  ;;  %v409_v9 = vsel %vm396_vm2, %v392_v7, -inf  ;;  %v394_v10 = vsel %vm378_vm7, %v370_v1, %v386_v4 }
 0x122   :  { %407 = vmax.xlane.f32.xlu2 %v406_v8  ;;  %410 = vmax.xlane.f32.xlu0 %v409_v9  ;;  %v415_v12 = vsel %vm396_vm2, %v394_v10, -inf }
 0x123   :  { %416 = vmax.xlane.f32.xlu1 %v415_v12  ;;  %v354_v14 = vpop.permute.xlu1 %353 }
 0x124   :  { %v371_v15 = vadd.f32 %v363_v11, %v354_v14  ;;  %v1198_v14 = vld [vmem:[#allocation6] sm:$0xff] }
 0x126   :  { %v387_v18 = vmul.f32 0.2, %v371_v15  ;;  %vm379_vm9 = vcmp.ge.f32.partialorder %v371_v15, 0.0 }
 0x128   :  { %v395_v19 = vsel %vm379_vm9, %v371_v15, %v387_v18 }
 0x129   :  { %v418_v21 = vsel %vm396_vm2, %v395_v19, -inf }
 0x12a   :  { %413 = vmax.xlane.f32.xlu2 %v412_v17 }
 0x132   :  { %419 = vmax.xlane.f32.xlu2 %v418_v21 }
 0x17d   :  { %v399_v22 = vpop.xlane.xlu2 %398 }
 0x17e   :  { %v421_v23 = vsub.f32 %v1154_v36, %v399_v22 }
 0x180   :  { %v429_v25 = vmul.f32 1.442695, %v421_v23 }
 0x182   :  { %950 = vpow2.f32 %v429_v25 }
 0x185   :  { %v402_v26 = vpop.xlane.xlu1 %401 }
 0x186   :  { %v422_v27 = vsub.f32 %v389_v44, %v402_v26 }
 0x188   :  { %v1166_v28 = vpop.eup %950  ;;  %v431_v29 = vmul.f32 1.442695, %v422_v27 }
 0x189   :  { %v445_v30 = vsel %vm396_vm2, %v1166_v28, 0.0 }
 0x18a   :  { %952 = vpow2.f32 %v431_v29  ;;  %446 = vadd.xlane.f32.xlu0 %v445_v30 }
 0x18d   :  { %v405_v31 = vpop.xlane.xlu0 %404 }
 0x18e   :  { %v423_v32 = vsub.f32 %v390_v55, %v405_v31 }
 0x190   :  { %v1170_v33 = vpop.eup %952  ;;  %v433_v34 = vmul.f32 1.442695, %v423_v32 }
 0x191   :  { %v448_v35 = vsel %vm396_vm2, %v1170_v33, 0.0 }
 0x192   :  { %954 = vpow2.f32 %v433_v34  ;;  %449 = vadd.xlane.f32.xlu2 %v448_v35 }
 0x195   :  { %v408_v36 = vpop.xlane.xlu2 %407  ;;  %v411_v37 = vpop.xlane.xlu0 %410 }
 0x196   :  { %v424_v38 = vsub.f32 %v391_v6, %v408_v36  ;;  %v417_v39 = vpop.xlane.xlu1 %416  ;;  %v425_v40 = vsub.f32 %v392_v7, %v411_v37 }
 0x197   :  { %v427_v43 = vsub.f32 %v394_v10, %v417_v39 }
 0x198   :  { %v1174_v41 = vpop.eup %954  ;;  %v435_v42 = vmul.f32 1.442695, %v424_v38  ;;  %v437_v44 = vmul.f32 1.442695, %v425_v40 }
 0x199   :  { %v451_v45 = vsel %vm396_vm2, %v1174_v41, 0.0  ;;  %v441_v46 = vmul.f32 1.442695, %v427_v43 }
 0x19a   :  { %956 = vpow2.f32 %v435_v42  ;;  %452 = vadd.xlane.f32.xlu1 %v451_v45 }
 0x19b   :  { %958 = vpow2.f32 %v437_v44 }
 0x19c   :  { %960 = vpow2.f32 %v441_v46 }
 0x19d   :  { %v414_v47 = vpop.xlane.xlu2 %413 }
 0x19e   :  { %v426_v48 = vsub.f32 %v393_v16, %v414_v47 }
 0x1a0   :  { %v1178_v49 = vpop.eup %956  ;;  %v439_v50 = vmul.f32 1.442695, %v426_v48 }
 0x1a1   :  { %v454_v51 = vsel %vm396_vm2, %v1178_v49, 0.0  ;;  %v1182_v52 = vpop.eup %958 }
 0x1a2   :  { %962 = vpow2.f32 %v439_v50  ;;  %455 = vadd.xlane.f32.xlu0 %v454_v51  ;;  %v457_v53 = vsel %vm396_vm2, %v1182_v52, 0.0  ;;  %v1186_v55 = vpop.eup %960 }
 0x1a3   :  { %458 = vadd.xlane.f32.xlu2 %v457_v53  ;;  %v463_v59 = vsel %vm396_vm2, %v1186_v55, 0.0 }
 0x1a5   :  { %v420_v54 = vpop.xlane.xlu2 %419 }
 0x1a6   :  { %v428_v56 = vsub.f32 %v395_v19, %v420_v54 }
 0x1a8   :  { %v1188_v57 = vpop.eup %962  ;;  %v443_v58 = vmul.f32 1.442695, %v428_v56 }
 0x1a9   :  { %v460_v60 = vsel %vm396_vm2, %v1188_v57, 0.0 }
 0x1aa   :  { %964 = vpow2.f32 %v443_v58  ;;  %464 = vadd.xlane.f32.xlu0 %v463_v59  ;;  %461 = vadd.xlane.f32.xlu1 %v460_v60 }
 0x1b0   :  { %v1194_v61 = vpop.eup %964 }
 0x1b1   :  { %v466_v62 = vsel %vm396_vm2, %v1194_v61, 0.0 }
 0x1b2   :  { %467 = vadd.xlane.f32.xlu1 %v466_v62 }
 0x1fd   :  { %v447_v63 = vpop.xlane.xlu0 %446 }
 0x1fe   :  { %966 = vrcp.f32 %v447_v63  ;;  %v480_v4 = vand.u32 2147483648, %v447_v63  ;;  %v478_v6 = vand.u32 2147483647, %v447_v63  ;;  %vm474_vm11 = vweird.f32 %v447_v63 }
 0x200   :  { %v481_v9 = vor.u32 1.1754944e-38, %v480_v4  ;;  %vm479_vm13 = vcmp.eq.f32.partialorder %v478_v6, 8.507059e+37 }
 0x204   :  { %v967_v0 = vpop.eup %966 }
 0x205   :  { %v470_v1 = vmul.f32 %v967_v0, %v447_v63  ;;  %v450_v2 = vpop.xlane.xlu2 %449  ;;  %vm475_vm10 = vweird.f32 %v967_v0 }
 0x206   :  { %968 = vrcp.f32 %v450_v2  ;;  %vm476_vm12 = vmor %vm474_vm11, %vm475_vm10  ;;  %v495_v17 = vand.u32 2147483648, %v450_v2  ;;  %v493_v19 = vand.u32 2147483647, %v450_v2  ;;  %vm489_vm15 = vweird.f32 %v450_v2 }
 0x207   :  { %v471_v3 = vsub.f32 1.0, %v470_v1 }
 0x208   :  { %v496_v25 = vor.u32 1.1754944e-38, %v495_v17  ;;  %vm494_vm3 = vcmp.eq.f32.partialorder %v493_v19, 8.507059e+37 }
 0x209   :  { %v472_v5 = vmul.f32 %v967_v0, %v471_v3 }
 0x20b   :  { %v473_v7 = vadd.f32 %v967_v0, %v472_v5 }
 0x20c   :  { %v969_v8 = vpop.eup %968 }
 0x20d   :  { %v477_v10 = vsel %vm476_vm12, %v967_v0, %v473_v7  ;;  %v485_v11 = vmul.f32 %v969_v8, %v450_v2  ;;  %v453_v12 = vpop.xlane.xlu1 %452  ;;  %vm490_vm14 = vweird.f32 %v969_v8 }
 0x20e   :  { %v482_v13 = vsel %vm479_vm13, %v481_v9, %v477_v10  ;;  %970 = vrcp.f32 %v453_v12  ;;  %vm491_vm1 = vmor %vm489_vm15, %vm490_vm14  ;;  %v510_v34 = vand.u32 2147483648, %v453_v12  ;;  %v508_v36 = vand.u32 2147483647, %v453_v12 }
 0x20f   :  { %v483_v15 = vmul.f32 %v1166_v28, %v482_v13  ;;  %v486_v16 = vsub.f32 1.0, %v485_v11  ;;  %vm504_vm5 = vweird.f32 %v453_v12 }
 0x210   :  { %v511_v39 = vor.u32 1.1754944e-38, %v510_v34  ;;  %vm509_vm7 = vcmp.eq.f32.partialorder %v508_v36, 8.507059e+37 }
 0x211   :  { %v487_v18 = vmul.f32 %v969_v8, %v486_v16  ;;  %v589_v21 = vadd.f32 %v483_v15, %v1198_v14 }
 0x213   :  { %v488_v22 = vadd.f32 %v969_v8, %v487_v18  ;;  %927 = vmatmul.msk.f32.vlgmr.msrb.gmra.mxu3 %vm396_vm2, %v589_v21 }
 0x214   :  { %v971_v23 = vpop.eup %970  ;;  %753 = vmatpush.msrb.mxu3 %v1148_v20 }
 0x215   :  { %v492_v26 = vsel %vm491_vm1, %v969_v8, %v488_v22  ;;  %v500_v27 = vmul.f32 %v971_v23, %v453_v12  ;;  %v456_v28 = vpop.xlane.xlu0 %455  ;;  %vm505_vm4 = vweird.f32 %v971_v23 }
 0x216   :  { %v497_v29 = vsel %vm494_vm3, %v496_v25, %v492_v26  ;;  %972 = vrcp.f32 %v456_v28  ;;  %v459_v32 = vpop.xlane.xlu2 %458  ;;  %vm506_vm6 = vmor %vm504_vm5, %vm505_vm4  ;;  %v525_v50 = vand.u32 2147483648, %v456_v28  ;;  %vm519_vm10 = vweird.f32 %v456_v28 }
 0x217   :  { %v498_v30 = vmul.f32 %v1170_v33, %v497_v29  ;;  %v501_v31 = vsub.f32 1.0, %v500_v27  ;;  %974 = vrcp.f32 %v459_v32  ;;  %v538_v54 = vand.u32 2147483647, %v459_v32 }
 0x218   :  { %v540_v56 = vand.u32 2147483648, %v459_v32  ;;  %vm534_vm11 = vweird.f32 %v459_v32 }
 0x219   :  { %v502_v35 = vmul.f32 %v971_v23, %v501_v31  ;;  %v590_v37 = vadd.f32 %v498_v30, %v1198_v14  ;;  %vm539_vm15 = vcmp.eq.f32.partialorder %v538_v54, 8.507059e+37 }
 0x21a   :  { %v541_v4 = vor.u32 1.1754944e-38, %v540_v56  ;;  %v1068_v56 = vmov 64.0  }
 0x21b   :  { %v503_v38 = vadd.f32 %v971_v23, %v502_v35  ;;  %928 = vmatmul.msk.f32.vlgmr.msrb.gmra.mxu1 %vm396_vm2, %v590_v37 }
 0x21c   :  { %v973_v20 = vpop.eup %972  ;;  %776 = vmatpush.msrb.mxu1 %v1151_v24  ;;  %v523_v24 = vand.u32 2147483647, %v456_v28 }
 0x21d   :  { %v507_v40 = vsel %vm506_vm6, %v971_v23, %v503_v38  ;;  %v515_v33 = vmul.f32 %v973_v20, %v456_v28  ;;  %v462_v42 = vpop.xlane.xlu1 %461  ;;  %v1208_v43 = vpop.xlane.xlu0 %464  ;;  %vm520_vm8 = vweird.f32 %v973_v20 }
 0x21e   :  { %v975_v44 = vpop.eup %974  ;;  %v512_v45 = vsel %vm509_vm7, %v511_v39, %v507_v40  ;;  %976 = vrcp.f32 %v462_v42  ;;  %vm521_vm12 = vmor %vm519_vm10, %vm520_vm8  ;;  %vm524_vm13 = vcmp.eq.f32.partialorder %v523_v24, 8.507059e+37  ;;  %v553_v11 = vand.u32 2147483647, %v462_v42 }
 0x21f   :  { %v513_v46 = vmul.f32 %v1174_v41, %v512_v45  ;;  %v530_v47 = vmul.f32 %v975_v44, %v459_v32  ;;  %v516_v48 = vsub.f32 1.0, %v515_v33  ;;  %978 = vrcp.f32 %v1208_v43 }
 0x220   :  { %vm535_vm9 = vweird.f32 %v975_v44  ;;  %v526_v41 = vor.u32 1.1754944e-38, %v525_v50  ;;  %v555_v12 = vand.u32 2147483648, %v462_v42  ;;  %vm549_vm3 = vweird.f32 %v462_v42 }
 0x221   :  { %v531_v51 = vsub.f32 1.0, %v530_v47  ;;  %v517_v53 = vmul.f32 %v973_v20, %v516_v48  ;;  %v591_v58 = vadd.f32 %v513_v46, %v1198_v14  ;;  %vm536_vm14 = vmor %vm534_vm11, %vm535_vm9  ;;  %v568_v18 = vand.u32 2147483647, %v1208_v43 }
 0x222   :  { %v570_v19 = vand.u32 2147483648, %v1208_v43  ;;  %vm554_vm6 = vcmp.eq.f32.partialorder %v553_v11, 8.507059e+37  ;;  %vm564_vm7 = vweird.f32 %v1208_v43 }
 0x223   :  { %v532_v59 = vmul.f32 %v975_v44, %v531_v51  ;;  %v518_v60 = vadd.f32 %v973_v20, %v517_v53  ;;  %929 = vmatmul.msk.f32.vlgmr.msra.gmra.mxu2 %vm396_vm2, %v591_v58  ;;  %vm569_vm9 = vcmp.eq.f32.partialorder %v568_v18, 8.507059e+37 }
 0x224   :  { %v977_v62 = vpop.eup %976  ;;  %v571_v29 = vor.u32 1.1754944e-38, %v570_v19 }
 0x225   :  { %v533_v63 = vadd.f32 %v975_v44, %v532_v59  ;;  %v522_v0 = vsel %vm521_vm12, %v973_v20, %v518_v60  ;;  %v545_v1 = vmul.f32 %v977_v62, %v462_v42  ;;  %v468_v2 = vpop.xlane.xlu1 %467  ;;  %v979_v3 = vpop.eup %978  ;;  %vm550_vm1 = vweird.f32 %v977_v62 }
 0x226   :  { %v527_v5 = vsel %vm524_vm13, %v526_v41, %v522_v0  ;;  %980 = vrcp.f32 %v468_v2  ;;  %v560_v9 = vmul.f32 %v979_v3, %v1208_v43  ;;  %vm565_vm4 = vweird.f32 %v979_v3  ;;  %vm551_vm5 = vmor %vm549_vm3, %vm550_vm1 }
 0x227   :  { %v537_v6 = vsel %vm536_vm14, %v975_v44, %v533_v63  ;;  %v528_v7 = vmul.f32 %v1178_v49, %v527_v5  ;;  %v546_v8 = vsub.f32 1.0, %v545_v1  ;;  %vm566_vm8 = vmor %vm564_vm7, %vm565_vm4  ;;  %v583_v35 = vand.u32 2147483647, %v468_v2 }
 0x228   :  { %v542_v10 = vsel %vm539_vm15, %v541_v4, %v537_v6  ;;  %v561_v16 = vsub.f32 1.0, %v560_v9  ;;  %v585_v36 = vand.u32 2147483648, %v468_v2  ;;  %vm579_vm11 = vweird.f32 %v468_v2 }
 0x229   :  { %v543_v13 = vmul.f32 %v1182_v52, %v542_v10  ;;  %v547_v15 = vmul.f32 %v977_v62, %v546_v8  ;;  %v592_v17 = vadd.f32 %v528_v7, %v1198_v14  ;;  %v556_v52 = vor.u32 1.1754944e-38, %v555_v12 }
 0x22a   :  { %v562_v22 = vmul.f32 %v979_v3, %v561_v16  ;;  %vm584_vm13 = vcmp.eq.f32.partialorder %v583_v35, 8.507059e+37  ;;  %982 = vrcp.f32 %v1068_v56 }
 0x22b   :  { %v593_v49 = vadd.f32 %v543_v13, %v1198_v14  ;;  %v548_v21 = vadd.f32 %v977_v62, %v547_v15  ;;  %930 = vmatmul.msk.f32.vlgmr.msra.gmra.mxu3 %vm396_vm2, %v592_v17 }
 0x22c   :  { %v981_v23 = vpop.eup %980  ;;  %v563_v26 = vadd.f32 %v979_v3, %v562_v22 }
 0x22d   :  { %v552_v25 = vsel %vm551_vm5, %v977_v62, %v548_v21  ;;  %v575_v27 = vmul.f32 %v981_v23, %v468_v2  ;;  %931 = vmatmul.msk.f32.vlgmr.msra.gmra.mxu1 %vm396_vm2, %v593_v49  ;;  %vm580_vm10 = vweird.f32 %v981_v23 }
 0x22e   :  { %v557_v28 = vsel %vm554_vm6, %v556_v52, %v552_v25  ;;  %v567_v31 = vsel %vm566_vm8, %v979_v3, %v563_v26  ;;  %vm581_vm12 = vmor %vm579_vm11, %vm580_vm10 }
 0x22f   :  { %v558_v30 = vmul.f32 %v1188_v57, %v557_v28  ;;  %v576_v32 = vsub.f32 1.0, %v575_v27  ;;  %v572_v34 = vsel %vm569_vm9, %v571_v29, %v567_v31  ;;  %v586_v57 = vor.u32 1.1754944e-38, %v585_v36 }
 0x230   :  { %v573_v37 = vmul.f32 %v1186_v55, %v572_v34  ;;  %v983_v5 = vpop.eup %982 }
 0x231   :  { %v577_v38 = vmul.f32 %v981_v23, %v576_v32  ;;  %v594_v20 = vadd.f32 %v558_v30, %v1198_v14  ;;  %v803_v13 = vmul.f32 64.0, %v983_v5 }
 0x232   :  { %v595_v39 = vadd.f32 %v573_v37, %v1198_v14 }
 0x233   :  { %v578_v40 = vadd.f32 %v981_v23, %v577_v38  ;;  %932 = vmatmul.msk.f32.vlgmr.msrb.gmra.mxu2 %vm396_vm2, %v594_v20  ;;  %v804_v27 = vsub.f32 1.0, %v803_v13 }
 0x234   :  { %933 = vmatmul.msk.f32.vlgmr.msrb.gmra.mxu3 %vm396_vm2, %v595_v39 }
 0x235   :  { %v582_v33 = vsel %vm581_vm12, %v981_v23, %v578_v40  ;;  %v805_v34 = vmul.f32 %v983_v5, %v804_v27 }
 0x236   :  { %v587_v42 = vsel %vm584_vm13, %v586_v57, %v582_v33 }
 0x237   :  { %v588_v43 = vmul.f32 %v1194_v61, %v587_v42  ;;  %v806_v20 = vadd.f32 %v983_v5, %v805_v34 }
 0x239   :  { %v596_v55 = vadd.f32 %v588_v43, %v1198_v14 }
 0x23b   :  { %934 = vmatmul.msk.f32.vlgmr.msrb.gmra.mxu1 %vm396_vm2, %v596_v55  ;;  %vm807_vm2 = vweird.f32 %v983_v5 }
 0x23c   :  { %v808_v42 = vsel %vm807_vm2, %v983_v5, %v806_v20 }
 0x296   :  { %v1234_v44 = vpop.f32.mrf.mxu3 }
 0x297   :  { %v810_v48 = vmul.f32 %v1234_v44, %v1234_v44  ;;  %v781_v14 = vsel %vm87_vm0, %v1234_v44, 0.0 }
 0x298   :  { %v1236_v45 = vpop.f32.mrf.mxu1 }
 0x299   :  { %v811_v47 = vmul.f32 %v1236_v45, %v1236_v45  ;;  %v782_v50 = vsel %vm87_vm0, %v1236_v45, 0.0  ;;  %v818_v58 = vsel %vm87_vm0, %v810_v48, 0.0 }
 0x29a   :  { %v783_v24 = vadd.f32 %v782_v50, %v781_v14 }
 0x29b   :  { %v819_v51 = vsel %vm87_vm0, %v811_v47, 0.0 }
 0x29c   :  { %v820_v41 = vadd.f32 %v819_v51, %v818_v58 }
 0x2a6   :  { %v1238_v46 = vpop.f32.mrf.mxu2 }
 0x2a7   :  { %v812_v61 = vmul.f32 %v1238_v46, %v1238_v46  ;;  %v784_v53 = vsel %vm87_vm0, %v1238_v46, 0.0 }
 0x2a8   :  { %v785_v63 = vadd.f32 %v784_v53, %v783_v24 }
 0x2a9   :  { %v821_v59 = vsel %vm87_vm0, %v812_v61, 0.0 }
 0x2aa   :  { %v1261_v0 = vpop.f32.mrf.mxu1  ;;  %v822_v2 = vadd.f32 %v821_v59, %v820_v41 }
 0x2ab   :  { %v814_v4 = vmul.f32 %v1261_v0, %v1261_v0  ;;  %v788_v7 = vsel %vm87_vm0, %v1261_v0, 0.0 }
 0x2ad   :  { %v825_v10 = vsel %vm87_vm0, %v814_v4, 0.0 }
 0x2ae   :  { %v1253_v54 = vpop.f32.mrf.mxu3 }
 0x2af   :  { %v786_v60 = vsel %vm87_vm0, %v1253_v54, 0.0  ;;  %v813_v62 = vmul.f32 %v1253_v54, %v1253_v54 }
 0x2b0   :  { %v787_v3 = vadd.f32 %v786_v60, %v785_v63 }
 0x2b1   :  { %v823_v1 = vsel %vm87_vm0, %v813_v62, 0.0  ;;  %v843_v62 = vld [vmem:[%s1335_s5] sm:$0x1] }
 0x2b2   :  { %v824_v6 = vadd.f32 %v823_v1, %v822_v2  ;;  %v789_v9 = vadd.f32 %v788_v7, %v787_v3  ;;  %v856_v2 = vld [vmem:[%s1336_s6] sm:$0x1] }
 0x2b4   :  { %v826_v16 = vadd.f32 %v825_v10, %v824_v6 }
 0x2b6   :  { %v1268_v8 = vpop.f32.mrf.mxu2 }
 0x2b7   :  { %v790_v11 = vsel %vm87_vm0, %v1268_v8, 0.0  ;;  %v815_v12 = vmul.f32 %v1268_v8, %v1268_v8  ;;  %v755_v17 = vpop.f32.mrf.mxu3 }
 0x2b8   :  { %v791_v15 = vadd.f32 %v790_v11, %v789_v9  ;;  %v1275_v18 = vpop.f32.mrf.mxu1  ;;  %v792_v49 = vsel %vm87_vm0, %v755_v17, 0.0  ;;  %v816_v21 = vmul.f32 %v755_v17, %v755_v17 }
 0x2b9   :  { %v827_v19 = vsel %vm87_vm0, %v815_v12, 0.0  ;;  %v817_v52 = vmul.f32 %v1275_v18, %v1275_v18  ;;  %v794_v26 = vsel %vm87_vm0, %v1275_v18, 0.0 }
 0x2ba   :  { %v828_v22 = vadd.f32 %v827_v19, %v826_v16  ;;  %v793_v23 = vadd.f32 %v792_v49, %v791_v15  ;;  %v829_v25 = vsel %vm87_vm0, %v816_v21, 0.0 }
 0x2bb   :  { %v831_v30 = vsel %vm87_vm0, %v817_v52, 0.0 }
 0x2bc   :  { %v830_v28 = vadd.f32 %v829_v25, %v828_v22  ;;  %v795_v29 = vadd.f32 %v794_v26, %v793_v23 }
 0x2be   :  { %v796_v31 = vrot.slane %v795_v29, 4  ;;  %v832_v32 = vadd.f32 %v831_v30, %v830_v28 }
 0x2c0   :  { %v797_v35 = vadd.f32 %v796_v31, %v795_v29  ;;  %v833_v36 = vrot.slane %v832_v32, 4 }
 0x2c2   :  { %v798_v37 = vrot.slane %v797_v35, 2  ;;  %v834_v38 = vadd.f32 %v833_v36, %v832_v32 }
 0x2c4   :  { %v799_v39 = vadd.f32 %v798_v37, %v797_v35  ;;  %v835_v40 = vrot.slane %v834_v38, 2 }
 0x2c6   :  { %v800_v57 = vrot.slane %v799_v39, 1  ;;  %v836_v33 = vadd.f32 %v835_v40, %v834_v38 }
 0x2c8   :  { %v801_v43 = vadd.f32 %v800_v57, %v799_v39  ;;  %v837_v55 = vrot.slane %v836_v33, 1 }
 0x2ca   :  { %v809_v47 = vmul.f32 %v808_v42, %v801_v43  ;;  %v838_v48 = vadd.f32 %v837_v55, %v836_v33 }
 0x2cc   :  { %v839_v50 = vmul.f32 %v838_v48, %v808_v42  ;;  %v840_v61 = vmul.f32 %v809_v47, %v809_v47 }
 0x2ce   :  { %v841_v14 = vsub.f32 %v839_v50, %v840_v61 }
 0x2d0   :  { %v842_v51 = vmax.f32 %v841_v14, 0.0 }
 0x2d2   :  { %v844_v53 = vadd.f32 1e-05, %v842_v51 }
 0x2d4   :  { %984 = vrsqrt.f32 %v844_v53  ;;  %vm851_vm15 = vweird.f32 %v844_v53 }
 0x2da   :  { %v985_v24 = vpop.eup %984 }
 0x2db   :  { %v846_v56 = vmul.f32 %v985_v24, %v844_v53  ;;  %vm852_vm14 = vweird.f32 %v985_v24 }
 0x2dc   :  { %vm853_vm1 = vmor %vm851_vm15, %vm852_vm14 }
 0x2dd   :  { %v847_v58 = vmul.f32 %v985_v24, %v846_v56 }
 0x2df   :  { %v848_v59 = vmul.f32 0.5, %v847_v58 }
 0x2e1   :  { %v849_v60 = vsub.f32 1.5, %v848_v59 }
 0x2e3   :  { %v850_v41 = vmul.f32 %v985_v24, %v849_v60 }
 0x2e5   :  { %v854_v63 = vsel %vm853_vm1, %v985_v24, %v850_v41 }
 0x2e6   :  { %v855_v1 = vmul.f32 %v854_v63, %v843_v62 }
 0x2e8   :  { %v857_v3 = vmul.f32 %v855_v1, %v809_v47  ;;  %v860_v4 = vperm.slane %v855_v1, 0 }
 0x2ea   :  { %v858_v5 = vsub.f32 %v856_v2, %v857_v3  ;;  %v862_v6 = vmul.f32 %v860_v4, %v1234_v44  ;;  %v863_v7 = vmul.f32 %v860_v4, %v1236_v45  ;;  %v864_v9 = vmul.f32 %v860_v4, %v1238_v46 }
 0x2eb   :  { %v865_v10 = vmul.f32 %v860_v4, %v1253_v54  ;;  %v866_v12 = vmul.f32 %v860_v4, %v1261_v0  ;;  %v867_v13 = vmul.f32 %v860_v4, %v1268_v8  ;;  %v868_v15 = vmul.f32 %v860_v4, %v755_v17 }
 0x2ec   :  { %v871_v11 = vperm.slane %v858_v5, 0  ;;  %v869_v22 = vmul.f32 %v860_v4, %v1275_v18 }
 0x2ee   :  { %v873_v16 = vadd.f32 %v871_v11, %v862_v6  ;;  %v874_v19 = vadd.f32 %v871_v11, %v863_v7  ;;  %v875_v49 = vadd.f32 %v871_v11, %v864_v9  ;;  %v876_v21 = vadd.f32 %v871_v11, %v865_v10 }
 0x2ef   :  { %v877_v23 = vadd.f32 %v871_v11, %v866_v12  ;;  %v878_v44 = vadd.f32 %v871_v11, %v867_v13  ;;  %v879_v52 = vadd.f32 %v871_v11, %v868_v15  ;;  %v880_v26 = vadd.f32 %v871_v11, %v869_v22 }
 0x2f0   :  { %v881_v45 = vmax.f32 %v873_v16, 0.0  ;;  %v882_v25 = vmax.f32 %v874_v19, 0.0  ;;  %v883_v46 = vmax.f32 %v875_v49, 0.0  ;;  %v884_v54 = vmax.f32 %v876_v21, 0.0 }
 0x2f1   :  { %v885_v27 = vmax.f32 %v877_v23, 0.0  ;;  %v886_v0 = vmax.f32 %v878_v44, 0.0  ;;  %v887_v8 = vmax.f32 %v879_v52, 0.0  ;;  %v888_v17 = vmax.f32 %v880_v26, 0.0 }
 0x2f2   :  { %889 = vst.msk [vmem:[%s1337_s7] sm:$0xff] %vm87_vm0, %v881_v45 }
 0x2f3   :  { %890 = vst.msk [vmem:[%s1337_s7 + $0x8] sm:$0xff] %vm87_vm0, %v882_v25 }
 0x2f4   :  { %891 = vst.msk [vmem:[%s1337_s7 + $0x10] sm:$0xff] %vm87_vm0, %v883_v46 }
 0x2f5   :  { %892 = vst.msk [vmem:[%s1337_s7 + $0x18] sm:$0xff] %vm87_vm0, %v884_v54 }
 0x2f6   :  { %893 = vst.msk [vmem:[%s1337_s7 + $0x20] sm:$0xff] %vm87_vm0, %v885_v27 }
 0x2f7   :  { %894 = vst.msk [vmem:[%s1337_s7 + $0x28] sm:$0xff] %vm87_vm0, %v886_v0 }
 0x2f8   :  { %895 = vst.msk [vmem:[%s1337_s7 + $0x30] sm:$0xff] %vm87_vm0, %v887_v8 }
 0x2f9   :  { %896 = vst.msk [vmem:[%s1337_s7 + $0x38] sm:$0xff] %vm87_vm0, %v888_v17 }
 0x2fa   :  { %901 = vsyncpa [#allocation3], 1 }
 0x2fb   :  { %902 = vsyncpa [#allocation5], 1 }

</bundles_post_ra>
